<compile_context>
chip_gen: v7x
topology: tpu7x:2x2x1
jax: 0.10.0
libtpu: 0.0.40
codegen_flags: <defaults>
</compile_context>

<pallas_src>
import functools

import jax
import jax.numpy as jnp
import numpy as np
from jax.experimental import pallas as pl
from jax.experimental.pallas import tpu as pltpu


# ----------------------- packed-weight column layout -------------------------

def _wpk_layout(C, Cb):
    L = {}
    L["A_UP"] = 0                      # upch1 scale, tiled per (bt, c) row
    L["B_UP"] = 1                      # upch1 bias,  tiled
    L["B1"] = 2                        # conv1 / conv3 / conv5 biases, tiled
    L["B3"] = 3
    L["B5"] = 4
    L["AUPB"] = 5                      # C cols: constant aup[c]  (bottleneck path)
    L["BUPB"] = L["AUPB"] + C          # C cols: constant bup[c]
    L["BBB"] = L["BUPB"] + C           # Cb cols: constant bottleneck bias
    L["WBB"] = L["BBB"] + Cb           # Cb*C cols: constant bottleneck weight
    L["W1"] = L["WBB"] + Cb * C        # Cb cols: conv1 weight, tiled
    L["W3"] = L["W1"] + Cb             # 9*Cb cols: conv3 weight, tiled (tap-major)
    L["W5"] = L["W3"] + 9 * Cb         # 25*Cb cols: conv5 weight, tiled (tap-major)
    L["TOTAL"] = L["W5"] + 25 * Cb
    return L


# ----------------------------- Pallas kernel --------------------------------

def _encoder_kernel(x_ref, wpk_ref, mask_ref, out_ref, *, H, W, C, Cb, roll_numpy):
    HW = H * W
    L = _wpk_layout(C, Cb)

    def col(j):                        # (Bt*C, 1) weight column, lane-broadcasts
        return wpk_ref[:, j:j + 1]

    def shift_amount(off):             # roll amount so that result[i] = v[i + off]
        return ((-off) if roll_numpy else off) % HW

    def win(v, dy, dx):                # (dy, dx)-shifted window with zero fill
        off = dy * W + dx
        if off == 0:
            return v
        return (pltpu.roll(v, shift_amount(off), axis=1)
                * mask_ref[(dy + 2) * 5 + (dx + 2)])

    x = x_ref[...]                     # (Bt*C, HW); every row of group bt = image bt

    # --- upch1: 1x1 conv (1 -> C) fused with BN + ReLU (batch-packed layout) --
    up = jnp.maximum(col(L["A_UP"]) * x + col(L["B_UP"]), 0.0)

    # --- pool3: 3x3 / stride-1 / pad-1 max pool of `up`, separable, fully in
    # registers via rolls.  Masking invalid taps to 0 is exact because up >= 0
    # and the window centre is always in range.
    vmax = jnp.maximum(up, jnp.maximum(win(up, -1, 0), win(up, 1, 0)))
    pooled = jnp.maximum(vmax, jnp.maximum(win(vmax, 0, -1), win(vmax, 0, 1)))

    # --- bottleneck: 1x1 conv (C -> Cb) fused with BN + ReLU, produced directly
    # in the "broadcast across output channels" layout (every row of batch group
    # bt holds bn[bt, cb]) so the tap loop below needs no cross-sublane traffic.
    ub = [jnp.maximum(col(L["AUPB"] + c) * x + col(L["BUPB"] + c), 0.0)
          for c in range(C)]           # ub[c] rows of group bt all hold up[bt, c]
    bnb = []
    for cb in range(Cb):
        z = col(L["BBB"] + cb)
        for c in range(C):
            z = z + col(L["WBB"] + cb * C + c) * ub[c]
        bnb.append(jnp.maximum(z, 0.0))

    # --- conv1 / conv3 / conv5: one shared 25-tap loop.  Each shifted window is
    # built once per (tap, cb) with an XLU roll and a single mask multiply (the
    # mask row is loaded once per tap) and reused by every branch.
    acc1 = col(L["B1"])
    acc3 = col(L["B3"])
    acc5 = col(L["B5"])
    for dy in range(-2, 3):
        for dx in range(-2, 3):
            t5 = (dy + 2) * 5 + (dx + 2)
            if dy == 0 and dx == 0:
                wins = bnb
            else:
                m = mask_ref[t5]
                s = shift_amount(dy * W + dx)
                wins = [pltpu.roll(b, s, axis=1) * m for b in bnb]
            for cb in range(Cb):
                acc5 = acc5 + col(L["W5"] + t5 * Cb + cb) * wins[cb]
            if abs(dy) <= 1 and abs(dx) <= 1:
                t3 = (dy + 1) * 3 + (dx + 1)
                for cb in range(Cb):
                    acc3 = acc3 + col(L["W3"] + t3 * Cb + cb) * wins[cb]
            if dy == 0 and dx == 0:
                for cb in range(Cb):
                    acc1 = acc1 + col(L["W1"] + cb) * wins[cb]

    out_ref[...] = (jnp.maximum(acc1, 0.0) + jnp.maximum(acc3, 0.0)
                    + jnp.maximum(acc5, 0.0) + pooled)


# ---------------- roll-semantics probe (sign of pltpu.roll) ------------------

@functools.lru_cache(maxsize=None)
def _roll_matches_numpy():
    """True iff pltpu.roll(x, s, axis) == np.roll(x, s, axis) on this backend."""
    def k(x_ref, o_ref):
        o_ref[...] = pltpu.roll(x_ref[...], 3, axis=1)

    x = np.arange(8 * 256, dtype=np.float32).reshape(8, 256)
    y = np.asarray(jax.block_until_ready(
        pl.pallas_call(k, out_shape=jax.ShapeDtypeStruct((8, 256), jnp.float32))(
            jnp.asarray(x))))
    if np.array_equal(y, np.roll(x, 3, axis=1)):
        return True
    if np.array_equal(y, np.roll(x, -3, axis=1)):
        return False
    raise AssertionError("unexpected pltpu.roll semantics")


# ------------------- host-side parameter fusion / packing --------------------

def _fuse(p, eps=1e-5):
    """Fold eval-mode BatchNorm + conv bias into (scaled weight, bias)."""
    gamma, beta, mean, var = p["bn"]
    scale = gamma / jnp.sqrt(var + eps)
    w = p["w"] * scale[:, None, None, None]
    bias = beta - mean * scale + p["b"] * scale
    return np.asarray(w, np.float32), np.asarray(bias, np.float32)


def _make_masks(H, W, rows):
    """(25, rows, H*W) 0/1 masks: tap (dy,dx) valid where (y+dy, x+dx) in-image."""
    yy, xx = np.mgrid[0:H, 0:W]
    masks = np.zeros((25, rows, H * W), np.float32)
    for dy in range(-2, 3):
        for dx in range(-2, 3):
            valid = ((yy + dy >= 0) & (yy + dy < H) &
                     (xx + dx >= 0) & (xx + dx < W)).reshape(-1)
            masks[(dy + 2) * 5 + (dx + 2)] = valid.astype(np.float32)[None, :]
    return masks


def pack_params(params, H, W, bt=2, eps=1e-5):
    """Host-side (call once, outside the forward jit): fold BN and pack all
    weights into one (bt*C, 128) operand plus the boundary-mask table."""
    wu, bu = _fuse(params["up"], eps)      # (C,1,1,1), (C,)
    wk, bk = _fuse(params["bk"], eps)      # (Cb,C,1,1), (Cb,)
    w1, b1 = _fuse(params["c1"], eps)      # (C,Cb,1,1), (C,)
    w3, b3 = _fuse(params["c3"], eps)      # (C,Cb,3,3), (C,)
    w5, b5 = _fuse(params["c5"], eps)      # (C,Cb,5,5), (C,)
    C = wu.shape[0]
    Cb = wk.shape[0]
    rows = bt * C
    L = _wpk_layout(C, Cb)
    assert L["TOTAL"] <= 128, "packed weight layout exceeds one 128-lane tile"
    assert rows % 8 == 0 and (H * W) % 128 == 0, "pick shapes filling (8,128) tiles"

    wpk = np.zeros((rows, 128), np.float32)

    def tile_c(v):                         # (C,) -> (rows,) repeated per batch slot
        return np.tile(np.asarray(v, np.float32), bt)

    wpk[:, L["A_UP"]] = tile_c(wu[:, 0, 0, 0])
    wpk[:, L["B_UP"]] = tile_c(bu)
    wpk[:, L["B1"]] = tile_c(b1)
    wpk[:, L["B3"]] = tile_c(b3)
    wpk[:, L["B5"]] = tile_c(b5)
    for c in range(C):
        wpk[:, L["AUPB"] + c] = float(wu[c, 0, 0, 0])
        wpk[:, L["BUPB"] + c] = float(bu[c])
    for cb in range(Cb):
        wpk[:, L["BBB"] + cb] = float(bk[cb])
        for c in range(C):
            wpk[:, L["WBB"] + cb * C + c] = float(wk[cb, c, 0, 0])
        wpk[:, L["W1"] + cb] = tile_c(w1[:, cb, 0, 0])
        for ky in range(3):
            for kx in range(3):
                wpk[:, L["W3"] + (ky * 3 + kx) * Cb + cb] = tile_c(w3[:, cb, ky, kx])
        for ky in range(5):
            for kx in range(5):
                wpk[:, L["W5"] + (ky * 5 + kx) * Cb + cb] = tile_c(w5[:, cb, ky, kx])

    return dict(wpk=jnp.asarray(wpk),
                masks=jnp.asarray(_make_masks(H, W, rows)),
                H=H, W=W, C=C, Cb=Cb, bt=bt)


def make_params(channels, key):
    """Random parameters in PyTorch layout (Conv2d OIHW weights + eval-mode BN)."""
    assert channels % 2 == 0
    bn_ch = channels // 2
    keys = iter(jax.random.split(key, 30))

    def conv_bn(cin, cout, k):
        return dict(
            w=0.3 * jax.random.normal(next(keys), (cout, cin, k, k), jnp.float32),
            b=0.1 * jax.random.normal(next(keys), (cout,), jnp.float32),
            bn=(jax.random.uniform(next(keys), (cout,), jnp.float32, 0.5, 1.5),   # gamma
                0.1 * jax.random.normal(next(keys), (cout,), jnp.float32),        # beta
                0.1 * jax.random.normal(next(keys), (cout,), jnp.float32),        # running mean
                jax.random.uniform(next(keys), (cout,), jnp.float32, 0.5, 1.5)))  # running var

    return dict(up=conv_bn(1, channels, 1),
                bk=conv_bn(channels, bn_ch, 1),
                c1=conv_bn(bn_ch, channels, 1),
                c3=conv_bn(bn_ch, channels, 3),
                c5=conv_bn(bn_ch, channels, 5))


# -------------------------------- wrapper ------------------------------------

@functools.partial(jax.jit, static_argnames=("H", "W", "C", "Cb", "bt", "roll_numpy"))
def _forward_impl(x_nchw, wpk, masks, *, H, W, C, Cb, bt, roll_numpy):
    B = x_nchw.shape[0]
    HW = H * W
    rows = bt * C
    G = (B + bt - 1) // bt
    Bp = G * bt

    x = x_nchw.reshape(B, HW).astype(jnp.float32)
    if Bp != B:
        x = jnp.pad(x, ((0, Bp - B), (0, 0)))
    # row bt*C + c of each grid block holds image (g*bt + bt_) -> lane-dense,
    # 8-sublane-dense activations inside the kernel.
    xb = jnp.broadcast_to(x.reshape(G, bt, 1, HW),
                          (G, bt, C, HW)).reshape(G, rows, HW)

    out = pl.pallas_call(
        functools.partial(_encoder_kernel, H=H, W=W, C=C, Cb=Cb,
                          roll_numpy=roll_numpy),
        out_shape=jax.ShapeDtypeStruct((G, rows, HW), jnp.float32),
        grid=(G,),
        in_specs=[
            pl.BlockSpec((None, rows, HW), lambda g: (g, 0, 0)),   # activations
            pl.BlockSpec((rows, 128), lambda g: (0, 0)),           # packed weights
            pl.BlockSpec((25, rows, HW), lambda g: (0, 0, 0)),     # boundary masks
        ],
        out_specs=pl.BlockSpec((None, rows, HW), lambda g: (g, 0, 0)),
        compiler_params=pltpu.CompilerParams(
            dimension_semantics=("parallel",)),
    )(xb, wpk, masks)

    out = out.reshape(Bp, C * HW)
    return out[:B]


def encoder_forward(x_nchw, packed):
    """x_nchw: (B, 1, H, W) float32 -> (B, C*H*W) float32 (Encoder.forward)."""
    return _forward_impl(x_nchw, packed["wpk"], packed["masks"],
                         H=packed["H"], W=packed["W"], C=packed["C"],
                         Cb=packed["Cb"], bt=packed["bt"],
                         roll_numpy=_roll_matches_numpy())


# --------------------------- pure-JAX reference -------------------------------

def _conv_bn_relu(x, p, pad, eps=1e-5):
    gamma, beta, mean, var = p["bn"]
    z = jax.lax.conv_general_dilated(
        x, p["w"], window_strides=(1, 1),
        padding=((pad, pad), (pad, pad)),
        dimension_numbers=("NCHW", "OIHW", "NCHW"),
        precision=jax.lax.Precision.HIGHEST)
    z = z + p["b"][None, :, None, None]
    scale = (gamma / jnp.sqrt(var + eps))[None, :, None, None]
    z = (z - mean[None, :, None, None]) * scale + beta[None, :, None, None]
    return jnp.maximum(z, 0.0)


def ref_forward(x_nchw, params):
    up = _conv_bn_relu(x_nchw, params["up"], pad=0)
    bn = _conv_bn_relu(up, params["bk"], pad=0)
    o1 = _conv_bn_relu(bn, params["c1"], pad=0)
    o3 = _conv_bn_relu(bn, params["c3"], pad=1)
    o5 = _conv_bn_relu(bn, params["c5"], pad=2)
    pooled = jax.lax.reduce_window(
        up, -jnp.inf, jax.lax.max,
        window_dimensions=(1, 1, 3, 3), window_strides=(1, 1, 1, 1),
        padding=((0, 0), (0, 0), (1, 1), (1, 1)))
    out = o1 + o3 + o5 + pooled
    return out.reshape(out.shape[0], -1)


# ----------------------------------- test -------------------------------------

if __name__ == "__main__":
    B, H, W, CH = 4, 16, 16, 4          # grid = B//2 = 2 parallel steps (v7x: both TCs)
    key = jax.random.PRNGKey(0)
    kx, kparam = jax.random.split(key)
    x = jax.random.normal(kx, (B, 1, H, W), jnp.float32)
    params = make_params(CH, kparam)

    packed = pack_params(params, H, W, bt=2)      # host-side, hoisted out of the forward
    out = jax.block_until_ready(encoder_forward(x, packed))
    ref = jax.block_until_ready(ref_forward(x, params))

    assert out.shape == (B, CH * H * W), out.shape
    np.testing.assert_allclose(np.asarray(out), np.asarray(ref),
                               rtol=1e-3, atol=1e-3)
    print("KERNEL_OK")
</pallas_src>

<mosaic_0001>
module attributes {stable_mosaic.version = 11 : i64} {
  func.func @k(%arg0: memref<8x256xf32, #tpu.memory_space<vmem>>, %arg1: memref<8x256xf32, #tpu.memory_space<vmem>>) attributes {dimension_semantics = [], scalar_prefetch = 0 : i64, scratch_operands = 0 : i64, tpu.core_type = #tpu.core_type<tc>} {
    %c0 = arith.constant 0 : index
    %c0_0 = arith.constant 0 : index
    %0 = vector.load %arg0[%c0, %c0_0] : memref<8x256xf32, #tpu.memory_space<vmem>>, vector<8x256xf32>
    %c3_i32 = arith.constant 3 : i32
    %1 = tpu.dynamic_rotate %0 by %c3_i32 dim 1 : vector<8x256xf32>, i32 -> vector<8x256xf32>
    %c0_1 = arith.constant 0 : index
    %c0_2 = arith.constant 0 : index
    %2 = vector.load %arg1[%c0_1, %c0_2] : memref<8x256xf32, #tpu.memory_space<vmem>>, vector<8x256xf32>
    tpu.vector_store %arg1[%c0_1, %c0_2], %1 {strides = array<i32>} : memref<8x256xf32, #tpu.memory_space<vmem>>, vector<8x256xf32>,
    return
  }
}

</mosaic_0001>

<bundles_post_ra>
// kernel: tpu_custom_call.1
= control target key start
LH: loop header
LB: loop body
LE: loop exit
PB: predicated region body
PF: predicated region fallthrough
CT: control target
= control target key end

     0   :  { %6 = vsyncpa [#allocation3], 0  ;;  %s137_s0 = inlined_call_operand.hbm [shape: f32[8,256], index: 0, kind: input, shape index: {}]   ;;  %s138_s1 = inlined_call_operand.hbm [shape: f32[8,256], index: 1, kind: output, shape index: {}]  }
   0x1   :  { %7 = vsyncpa [#allocation4], 0  ;;  %s100_s6 = smov [#allocation2]   ;;  %s52_s10 = scalar_lea.hbm %s137_s0, 256 }
   0x2   :  { %s14_s7 = sshll.u32 %s100_s6, 4  ;;  %p53_p0 = scmp.ne.s32.totalorder %s137_s0, %s52_s10  ;;  %s15_s7 = int_to_ptr.vmem [resolvable:$true] %s14_s7 }
   0x3   :  { %p56_p1 = scmp.lt.u32.totalorder %s52_s10, %s137_s0 }
   0x5   :  { %p58_p2 = pnand %p56_p1, %p53_p0 }
   0x7   :  { %61 = shalt.err (!%p58_p2)
}
   0x8   :  { %s62_s15 = scalar_lea.vmem %s15_s7, 256  ;;  %p67_p4 = scmp.lt.s32.totalorder %s15_s7, %s15_s7 }
   0x9   :  { %p63_p3 = scmp.ne.s32.totalorder %s15_s7, %s62_s15  ;;  %p68_p5 = scmp.lt.s32.totalorder %s62_s15, %s62_s15 }
   0xb   :  { %p69_p6 = por %p68_p5, %p67_p4 }
   0xd   :  { %p70_p7 = pnand %p69_p6, %p63_p3 }
   0xf   :  { %73 = shalt.err (!%p70_p7)
}
  0x10   :  { %17 = dma.hbm_to_vmem [thread:$0]  %s137_s0, 256, %s15_s7, [#allocation3]  }
  0x11   :  { %96 = dma.done.wait [#allocation3], 256  }
  0x12   :  { %97 = vsyncadd [#allocation3], 4294967040  ;;  %v21_v0 = vld [vmem:[#allocation2] sm:$0xff]  ;;  %s101_s18 = smov 3   ;;  %v22_v1 = vld [vmem:[#allocation2 + $0x8] sm:$0xff]  ;;  %v27_v2 = vlaneseq  ;;  %s102_s19 = smov [#allocation5]  }
  0x13   :  { %23 = vrot.lane.b32.xlu0 %v21_v0, %s101_s18  ;;  %s40_s20 = sshll.u32 %s102_s19, 4  ;;  %s41_s20 = int_to_ptr.vmem [resolvable:$true] %s40_s20 }
  0x14   :  { %v28_v3 = vand.u32 127, %v27_v2  ;;  %s74_s0 = scalar_lea.vmem %s41_s20, 256  ;;  %p79_p9 = scmp.lt.s32.totalorder %s41_s20, %s41_s20 }
  0x15   :  { %p75_p8 = scmp.ne.s32.totalorder %s41_s20, %s74_s0  ;;  %p80_p10 = scmp.lt.s32.totalorder %s74_s0, %s74_s0 }
  0x16   :  { %vm29_vm0 = vcmp.lt.s32.totalorder %v28_v3, 3 }
  0x17   :  { %25 = vrot.lane.b32.xlu0 %v22_v1, %s101_s18  ;;  %p81_p11 = por %p80_p10, %p79_p9 }
  0x19   :  { %p82_p12 = pnand %p81_p11, %p75_p8 }
  0x85   :  { %v24_v4 = vpop.permute.xlu0 %23 }
  0x89   :  { %v26_v5 = vpop.permute.xlu0 %25 }
  0x8a   :  { %v30_v6 = vsel %vm29_vm0, %v24_v4, %v26_v5  ;;  %v31_v7 = vsel %vm29_vm0, %v26_v5, %v24_v4 }
  0x8b   :  { %32 = vst [vmem:[#allocation5] sm:$0xff] %v31_v7  ;;  %33 = vst [vmem:[#allocation5 + $0x8] sm:$0xff] %v30_v6 }
  0x8c   :  { %85 = shalt.err (!%p82_p12)
}
  0x8d   :  { %s86_s23 = scalar_lea.hbm %s138_s1, 256 }
  0x8e   :  { %p87_p13 = scmp.ne.s32.totalorder %s138_s1, %s86_s23  ;;  %p90_p0 = scmp.lt.u32.totalorder %s86_s23, %s138_s1 }
  0x90   :  { %p92_p1 = pnand %p90_p0, %p87_p13 }
  0x92   :  { %95 = shalt.err (!%p92_p1)
}
  0x93   :  { %43 = dma.vmem_to_hbm [thread:$0]  %s41_s20, 256, %s138_s1, [#allocation4]  }
  0x94   :  { %98 = dma.done.wait [#allocation4], 256  }
  0x95   :  { %99 = vsyncadd [#allocation4], 4294967040 }
  0x96   :  { %47 = vsyncpa [#allocation3], 1 }
  0x97   :  { %48 = vsyncpa [#allocation4], 1 }

</bundles_post_ra>
